<compile_context>
chip_gen: v7x
topology: tpu7x:2x2x1
jax: 0.10.0
libtpu: 0.0.40
codegen_flags: <defaults>
</compile_context>

<pallas_src>
import functools

import jax
import jax.numpy as jnp
from jax.experimental import pallas as pl
from jax.experimental.pallas import tpu as pltpu


LANE = 128  # lane / MXU alignment; 128 is sufficient on v5e/v6e/v7x


# ---------------------------------------------------------------------------
# Kernels
# ---------------------------------------------------------------------------
def _gegelu(y, s, approx):
    # y * sigmoid(s*y).  exp + reciprocal lower to the EUP slot -> effectively free
    # under MXU-bound work; approx=False keeps an exact reciprocal.
    if approx:
        return y * pl.reciprocal(1.0 + jnp.exp(-s * y), approx=True)
    return y * jax.nn.sigmoid(s * y)


def _fused_kernel_single_k(scale_ref, x_ref, w_ref, b_ref, o_ref, *, mxu_bf16, approx):
    """Single K step: y = x @ W + b, then y * sigmoid(scale * y), written directly."""
    x = x_ref[...]
    w = w_ref[...]
    if mxu_bf16:
        x = x.astype(jnp.bfloat16)   # in-kernel cast, hidden under the MXU
        w = w.astype(jnp.bfloat16)
    y = jnp.dot(x, w, preferred_element_type=jnp.float32)
    y = y + b_ref[...].astype(jnp.float32)            # (1, tn) broadcasts over tm
    s = scale_ref[0].astype(jnp.float32)
    o_ref[...] = _gegelu(y, s, approx).astype(o_ref.dtype)


def _fused_kernel_reduce_k(scale_ref, x_ref, w_ref, b_ref, o_ref, acc_ref, *, mxu_bf16, approx):
    """K-tiled variant with an f32 VMEM accumulator (only when H is too big for VMEM)."""
    k = pl.program_id(2)

    @pl.when(k == 0)
    def _():
        acc_ref[...] = jnp.zeros_like(acc_ref)

    x = x_ref[...]
    w = w_ref[...]
    if mxu_bf16:
        x = x.astype(jnp.bfloat16)
        w = w.astype(jnp.bfloat16)
    acc_ref[...] += jnp.dot(x, w, preferred_element_type=jnp.float32)

    @pl.when(k == pl.num_programs(2) - 1)
    def _():
        y = acc_ref[...] + b_ref[...].astype(jnp.float32)
        s = scale_ref[0].astype(jnp.float32)
        o_ref[...] = _gegelu(y, s, approx).astype(o_ref.dtype)


# ---------------------------------------------------------------------------
# Tiling policy
# ---------------------------------------------------------------------------
def _hw_config():
    """Per-generation VMEM budget; tile preferences are generation-agnostic (128-aligned)."""
    kind = ""
    try:
        kind = jax.devices()[0].device_kind.lower()
    except Exception:
        pass
    is_v7 = "v7" in kind  # v7x: 64 MiB physical VMEM per TensorCore -> keep headroom
    return dict(
        tm_pref=512,
        tn_cap=4096,       # tn == I for Roberta-sized intermediates -> weight streamed once
        tk_cap=2048,       # collapse K whenever H <= 2048 (typical hidden sizes)
        vmem=(48 << 20) if is_v7 else (96 << 20),
    )


def _lane_tile(dim, cap):
    """Tile for a non-reduction dim: full extent if small, else the largest 128-multiple
    <= cap.  Ragged tails are handled by a cdiv grid (edge output blocks are masked)."""
    if dim <= cap:
        return dim
    return max(LANE, (cap // LANE) * LANE)


def _k_tile(H, cap):
    """K must never be ragged (OOB padding would be accumulated into valid outputs), so
    use the largest 128-multiple exact divisor of H that is <= cap, else keep K untiled."""
    if H <= cap:
        return H
    t = (cap // LANE) * LANE
    while t >= LANE:
        if H % t == 0:
            return t
        t -= LANE
    return H


def _vmem_bytes(tm, tn, tk, grid_k, x_b, w_b, out_b, mxu_bf16):
    cast = 2 if mxu_bf16 else 0
    return (2 * tm * tk * x_b + tm * tk * cast        # x tile (double-buffered) + bf16 copy
            + 2 * tk * tn * w_b + tk * tn * cast      # W tile (double-buffered) + bf16 copy
            + 2 * tm * tn * out_b                     # output tile (double-buffered)
            + 2 * tm * tn * 4                         # f32 matmul result + epilogue temporaries
            + (tm * tn * 4 if grid_k > 1 else 0)      # f32 accumulator (reduce-K path only)
            + 2 * tn * 4)                             # bias tile


# ---------------------------------------------------------------------------
# Wrapper
# ---------------------------------------------------------------------------
@functools.partial(jax.jit, static_argnames=("mxu_bf16_inputs", "approx_sigmoid", "out_dtype"))
def flash_roberta_intermediate(hidden_states, weight, bias, scale, *,
                               mxu_bf16_inputs=True, approx_sigmoid=True, out_dtype=None):
    """hidden_states: [B, S, H]; weight: [H, I] (pre-transposed vs torch); bias: [I]; scale: (1,)."""
    B, S, H = hidden_states.shape
    I = weight.shape[1]
    M = B * S
    out_dtype = hidden_states.dtype if out_dtype is None else jnp.dtype(out_dtype)

    hw = _hw_config()

    # No host-side converts: pass the original arrays, cast tiles in-kernel.
    x2d = hidden_states.reshape(M, H)
    b2d = bias.reshape(1, I)

    x_b = jnp.dtype(x2d.dtype).itemsize
    w_b = jnp.dtype(weight.dtype).itemsize
    out_b = jnp.dtype(out_dtype).itemsize

    tk = _k_tile(H, hw["tk_cap"])
    tn = _lane_tile(I, hw["tn_cap"])
    tm = _lane_tile(M, hw["tm_pref"])
    grid_k = H // tk  # _k_tile guarantees tk | H

    # Shrink under the VMEM budget: K first (only costs an f32 accumulator), then N, then M.
    while _vmem_bytes(tm, tn, tk, grid_k, x_b, w_b, out_b, mxu_bf16_inputs) > hw["vmem"]:
        if tk > LANE:
            new_tk = _k_tile(H, tk // 2)
            if new_tk < tk:
                tk = new_tk
                grid_k = H // tk
                continue
        if tn > LANE:
            new_tn = _lane_tile(I, max(LANE, tn // 2))
            if new_tn < tn:
                tn = new_tn
                continue
        if tm > LANE:
            new_tm = _lane_tile(M, max(LANE, tm // 2))
            if new_tm < tm:
                tm = new_tm
                continue
        break  # cannot shrink further; rely on vmem_limit_bytes headroom

    grid_i, grid_j = pl.cdiv(M, tm), pl.cdiv(I, tn)
    scale_spec = pl.BlockSpec(memory_space=pltpu.MemorySpace.SMEM)
    cp_kwargs = dict(vmem_limit_bytes=hw["vmem"])

    if grid_k == 1:
        # K collapsed: no accumulator, no pl.when phases.  x block is constant across the
        # inner j axis (DMA'd once per i); with tn == I the weight is streamed exactly once.
        kernel = functools.partial(_fused_kernel_single_k,
                                   mxu_bf16=mxu_bf16_inputs, approx=approx_sigmoid)
        out = pl.pallas_call(
            kernel,
            out_shape=jax.ShapeDtypeStruct((M, I), out_dtype),
            grid_spec=pltpu.PrefetchScalarGridSpec(
                num_scalar_prefetch=0,
                grid=(grid_i, grid_j),
                in_specs=[
                    scale_spec,
                    pl.BlockSpec((tm, tk), lambda i, j: (i, 0)),
                    pl.BlockSpec((tk, tn), lambda i, j: (0, j)),
                    pl.BlockSpec((1, tn), lambda i, j: (0, j)),
                ],
                out_specs=pl.BlockSpec((tm, tn), lambda i, j: (i, j)),
            ),
            compiler_params=pltpu.CompilerParams(
                dimension_semantics=("parallel", "parallel"), **cp_kwargs
            ),
        )(scale, x2d, weight, b2d)
    else:
        kernel = functools.partial(_fused_kernel_reduce_k,
                                   mxu_bf16=mxu_bf16_inputs, approx=approx_sigmoid)
        out = pl.pallas_call(
            kernel,
            out_shape=jax.ShapeDtypeStruct((M, I), out_dtype),
            grid_spec=pltpu.PrefetchScalarGridSpec(
                num_scalar_prefetch=0,
                grid=(grid_i, grid_j, grid_k),
                in_specs=[
                    scale_spec,
                    pl.BlockSpec((tm, tk), lambda i, j, k: (i, k)),
                    pl.BlockSpec((tk, tn), lambda i, j, k: (k, j)),
                    pl.BlockSpec((1, tn), lambda i, j, k: (0, j)),
                ],
                out_specs=pl.BlockSpec((tm, tn), lambda i, j, k: (i, j)),
                scratch_shapes=[pltpu.VMEM((tm, tn), jnp.float32)],
            ),
            compiler_params=pltpu.CompilerParams(
                dimension_semantics=("parallel", "parallel", "arbitrary"), **cp_kwargs
            ),
        )(scale, x2d, weight, b2d)

    return out.reshape(B, S, I)


# ---------------------------------------------------------------------------
# Self-test (small shapes implied by the module)
# ---------------------------------------------------------------------------
if __name__ == "__main__":
    batch, seq, hidden_size, intermediate_size = 2, 8, 32, 64

    key = jax.random.PRNGKey(0)
    k_x, k_w, k_b = jax.random.split(key, 3)

    hidden_states = jax.random.normal(k_x, (batch, seq, hidden_size), dtype=jnp.float32)
    # nn.Linear(hidden_size, intermediate_size): torch weight is [I, H]; we store it
    # pre-transposed as [H, I] for the kernel.
    weight = jax.random.normal(k_w, (hidden_size, intermediate_size), dtype=jnp.float32) * 0.02
    bias = jax.random.normal(k_b, (intermediate_size,), dtype=jnp.float32) * 0.02
    scale = jnp.ones((1,), dtype=jnp.float32)  # GeGeLU scale, initialized to 1.0

    out = flash_roberta_intermediate(hidden_states, weight, bias, scale)
    out = jax.block_until_ready(out)

    # Pure-JAX reference (same bf16 rounding of x/W as the default MXU path, f32 accumulation).
    xq = hidden_states.astype(jnp.bfloat16).astype(jnp.float32)
    wq = weight.astype(jnp.bfloat16).astype(jnp.float32)
    y_ref = jnp.einsum("bsh,hi->bsi", xq, wq) + bias
    ref = y_ref * jax.nn.sigmoid(scale[0] * y_ref)

    assert out.shape == (batch, seq, intermediate_size)
    assert out.dtype == hidden_states.dtype
    # Tolerance covers the EUP approx-reciprocal in the fused sigmoid epilogue.
    assert jnp.allclose(out, ref, atol=5e-3, rtol=5e-3), "mismatch vs reference"

    print("KERNEL_OK")
</pallas_src>

<mosaic_0001>
module attributes {stable_mosaic.version = 11 : i64} {
  func.func @_fused_kernel_single_k(%arg0: i32, %arg1: i32, %arg2: memref<1xf32, #tpu.memory_space<smem>>, %arg3: memref<16x32xf32, #tpu.memory_space<vmem>>, %arg4: memref<32x64xf32, #tpu.memory_space<vmem>>, %arg5: memref<1x64xf32, #tpu.memory_space<vmem>>, %arg6: memref<16x64xf32, #tpu.memory_space<vmem>>) attributes {dimension_semantics = [#tpu.dimension_semantics<parallel>, #tpu.dimension_semantics<parallel>], iteration_bounds = array<i64: 1, 1>, scalar_prefetch = 0 : i64, scratch_operands = 0 : i64, tpu.core_type = #tpu.core_type<tc>, window_params = [{transform_indices = @transform_0, window_bounds = array<i64: 1>}, {transform_indices = @transform_1, window_bounds = array<i64: 16, 32>}, {transform_indices = @transform_2, window_bounds = array<i64: 32, 64>}, {transform_indices = @transform_3, window_bounds = array<i64: 1, 64>}, {transform_indices = @transform_4, window_bounds = array<i64: 16, 64>}]} {
    %c0 = arith.constant 0 : index
    %c0_0 = arith.constant 0 : index
    %0 = vector.load %arg3[%c0, %c0_0] : memref<16x32xf32, #tpu.memory_space<vmem>>, vector<16x32xf32>
    %c0_1 = arith.constant 0 : index
    %c0_2 = arith.constant 0 : index
    %1 = vector.load %arg4[%c0_1, %c0_2] : memref<32x64xf32, #tpu.memory_space<vmem>>, vector<32x64xf32>
    %2 = arith.truncf %0 : vector<16x32xf32> to vector<16x32xbf16>
    %3 = arith.truncf %1 : vector<32x64xf32> to vector<32x64xbf16>
    %cst = arith.constant dense<0.000000e+00> : vector<16x64xf32>
    %4 = tpu.matmul %2, %3, %cst {dimension_numbers = #tpu.dot_dimension_numbers<[1], [0], [0], [1], [0, 0, 1, 1], [], []>} : vector<16x32xbf16>, vector<32x64xbf16>, vector<16x64xf32> -> vector<16x64xf32>
    %c0_3 = arith.constant 0 : index
    %c0_4 = arith.constant 0 : index
    %5 = vector.load %arg5[%c0_3, %c0_4] : memref<1x64xf32, #tpu.memory_space<vmem>>, vector<1x64xf32>
    %6 = vector.broadcast %5 : vector<1x64xf32> to vector<16x64xf32>
    %7 = arith.addf %4, %6 : vector<16x64xf32>
    %c0_5 = arith.constant 0 : index
    %8 = memref.load %arg2[%c0_5] : memref<1xf32, #tpu.memory_space<smem>>
    %cst_6 = arith.constant 0.000000e+00 : f32
    %9 = arith.subf %cst_6, %8 : f32
    %10 = vector.broadcast %9 : f32 to vector<16x64xf32>
    %11 = arith.mulf %10, %7 : vector<16x64xf32>
    %12 = math.exp %11 : vector<16x64xf32>
    %cst_7 = arith.constant 1.000000e+00 : f32
    %13 = vector.broadcast %cst_7 : f32 to vector<16x64xf32>
    %14 = arith.addf %13, %12 : vector<16x64xf32>
    %15 = tpu.reciprocal %14 {approx = true} : vector<16x64xf32> -> vector<16x64xf32>
    %16 = arith.mulf %7, %15 : vector<16x64xf32>
    %c0_8 = arith.constant 0 : index
    %c0_9 = arith.constant 0 : index
    %17 = vector.load %arg6[%c0_8, %c0_9] : memref<16x64xf32, #tpu.memory_space<vmem>>, vector<16x64xf32>
    tpu.vector_store %arg6[%c0_8, %c0_9], %16 {strides = array<i32>} : memref<16x64xf32, #tpu.memory_space<vmem>>, vector<16x64xf32>,
    return
  }
  func.func @transform_0(%arg0: i32, %arg1: i32) -> i32 {
    %c0_i32 = arith.constant 0 : i32
    %c0_i32_0 = arith.constant 0 : i32
    return %c0_i32 : i32
  }
  func.func @transform_1(%arg0: i32, %arg1: i32) -> (i32, i32) {
    %c0_i32 = arith.constant 0 : i32
    %c0_i32_0 = arith.constant 0 : i32
    return %arg0, %c0_i32 : i32, i32
  }
  func.func @transform_2(%arg0: i32, %arg1: i32) -> (i32, i32) {
    %c0_i32 = arith.constant 0 : i32
    %c0_i32_0 = arith.constant 0 : i32
    return %c0_i32, %arg1 : i32, i32
  }
  func.func @transform_3(%arg0: i32, %arg1: i32) -> (i32, i32) {
    %c0_i32 = arith.constant 0 : i32
    %c0_i32_0 = arith.constant 0 : i32
    return %c0_i32, %arg1 : i32, i32
  }
  func.func @transform_4(%arg0: i32, %arg1: i32) -> (i32, i32) {
    %c0_i32 = arith.constant 0 : i32
    return %arg0, %arg1 : i32, i32
  }
}

</mosaic_0001>

<bundles_post_ra>
// kernel: flash_roberta_intermediate.1
= control target key start
LH: loop header
LB: loop body
LE: loop exit
PB: predicated region body
PF: predicated region fallthrough
CT: control target
= control target key end

     0   :  { %10 = vsyncpa [#allocation4], 0  ;;  %s379_s0 = inlined_call_operand.<no memory space> [shape: f32[1], index: 0, kind: input, shape index: {}]   ;;  %s380_s1 = inlined_call_operand.hbm [shape: f32[16,32], index: 1, kind: input, shape index: {}]   ;;  %s381_s2 = inlined_call_operand.hbm [shape: f32[32,64], index: 2, kind: input, shape index: {}]   ;;  %s382_s3 = inlined_call_operand.hbm [shape: f32[1,64], index: 3, kind: input, shape index: {}]   ;;  %s383_s4 = inlined_call_operand.hbm [shape: f32[16,64], index: 4, kind: output, shape index: {}]  }
   0x1   :  { %11 = vsyncpa [#allocation7], 0 }
   0x2   :  { %12 = vsyncpa [#allocation5], 0  ;;  %s279_s15 = smov [#allocation6]   ;;  %s280_s17 = smov [#allocation3]  }
   0x3   :  { %s32_s16 = sshll.u32 %s279_s15, 4  ;;  %s20_s18 = sshll.u32 %s280_s17, 4  ;;  %s33_s16 = int_to_ptr.vmem [resolvable:$true] %s32_s16  ;;  %s312_s18 = int_to_ptr.vmem [resolvable:$true] %s20_s18 }
   0x4   :  { %s185_s21 = scalar_lea.hbm %s381_s2, 512 }
   0x5   :  { %p186_p0 = scmp.ne.s32.totalorder %s381_s2, %s185_s21  ;;  %p189_p1 = scmp.lt.u32.totalorder %s185_s21, %s381_s2 }
   0x7   :  { %p191_p2 = pnand %p189_p1, %p186_p0 }
   0x9   :  { %194 = shalt.err (!%p191_p2)
}
   0xa   :  { %s195_s26 = scalar_lea.vmem %s33_s16, 512  ;;  %p200_p4 = scmp.lt.s32.totalorder %s33_s16, %s33_s16 }
   0xb   :  { %p196_p3 = scmp.ne.s32.totalorder %s33_s16, %s195_s26  ;;  %p201_p5 = scmp.lt.s32.totalorder %s195_s26, %s195_s26 }
   0xd   :  { %p202_p6 = por %p201_p5, %p200_p4 }
   0xf   :  { %p203_p7 = pnand %p202_p6, %p196_p3 }
  0x11   :  { %206 = shalt.err (!%p203_p7)
}
  0x12   :  { %s281_s27 = smov 128   ;;  %s282_s28 = smov 8  }
  0x13   :  { %38 = dma.hbm_to_vmem [thread:$0]  %s381_s2, 512, %s33_s16, [#allocation7], %s281_s27, %s281_s27, %s282_s28  }
  0x14   :  { %s207_s7 = scalar_lea.hbm %s380_s1, 256 }
  0x15   :  { %p208_p8 = scmp.ne.s32.totalorder %s380_s1, %s207_s7  ;;  %p211_p9 = scmp.lt.u32.totalorder %s207_s7, %s380_s1 }
  0x17   :  { %p213_p10 = pnand %p211_p9, %p208_p8 }
  0x19   :  { %216 = shalt.err (!%p213_p10)
}
  0x1a   :  { %s217_s12 = scalar_lea.vmem %s312_s18, 256  ;;  %p222_p12 = scmp.lt.s32.totalorder %s312_s18, %s312_s18 }
  0x1b   :  { %p218_p11 = scmp.ne.s32.totalorder %s312_s18, %s217_s12  ;;  %p223_p13 = scmp.lt.s32.totalorder %s217_s12, %s217_s12 }
  0x1d   :  { %p224_p0 = por %p223_p13, %p222_p12 }
  0x1f   :  { %p225_p1 = pnand %p224_p0, %p218_p11 }
  0x21   :  { %228 = shalt.err (!%p225_p1)
}
  0x22   :  { %26 = dma.hbm_to_vmem [thread:$0]  %s380_s1, 256, %s312_s18, [#allocation4], %s281_s27, %s281_s27, %s282_s28  }
  0x23   :  { %s283_s14 = smov [#allocation8]   ;;  %s229_s19 = scalar_lea.hbm %s382_s3, 16 }
  0x24   :  { %s45_s15 = sshll.u32 %s283_s14, 4  ;;  %p230_p2 = scmp.ne.s32.totalorder %s382_s3, %s229_s19  ;;  %s46_s15 = int_to_ptr.vmem [resolvable:$true] %s45_s15 }
  0x25   :  { %p233_p3 = scmp.lt.u32.totalorder %s229_s19, %s382_s3 }
  0x27   :  { %p235_p4 = pnand %p233_p3, %p230_p2 }
  0x29   :  { %238 = shalt.err (!%p235_p4)
}
  0x2a   :  { %s239_s24 = scalar_lea.vmem %s46_s15, 16  ;;  %s243_s1 = scalar_lea.vmem %s46_s15, 32 }
  0x2b   :  { %p240_p5 = scmp.ne.s32.totalorder %s46_s15, %s239_s24  ;;  %p244_p6 = scmp.lt.s32.totalorder %s46_s15, %s46_s15 }
  0x2c   :  { %p245_p7 = scmp.lt.s32.totalorder %s243_s1, %s239_s24 }
  0x2e   :  { %p246_p8 = por %p245_p7, %p244_p6 }
  0x30   :  { %p247_p9 = pnand %p246_p8, %p240_p5 }
  0x32   :  { %250 = shalt.err (!%p247_p9)
}
  0x33   :  { %48 = dma.hbm_to_vmem [thread:$0]  %s382_s3, 16, %s46_s15, [#allocation7]  }
  0x34   :  { %273 = dma.done.wait [#allocation4], 256  }
  0x35   :  { %274 = vsyncadd [#allocation4], 4294967040 }
  0x36   :  { %275 = dma.done.wait [#allocation7], 528  }
  0x37   :  { %276 = vsyncadd [#allocation7], 4294966768  ;;  %v284_v0 = vmov 0.0   ;;  %vm285_vm0 = vmmov 0   ;;  %v61_v1 = vld [vmem:[#allocation6] sm:$0xff]  ;;  %v62_v2 = vld [vmem:[#allocation6 + $0x8] sm:$0xff] }
  0x38   :  { %161 = vmatprep.subr.bf16.mxu0 %v284_v0  ;;  %165 = vmatprep.mubr.msk.bf16.mxu0 %vm285_vm0, %v284_v0  ;;  %v63_v3 = vld [vmem:[#allocation6 + $0x10] sm:$0xff]  ;;  %v66_v4 = vpack.c.bf16 %v62_v2, %v61_v1  ;;  %v64_v5 = vld [vmem:[#allocation6 + $0x18] sm:$0xff]  ;;  %vm75_vm1 = vcmask 261120   ;;  %s121_s29 = ssub.f32 0.0, %s379_s0  ;;  %v156_v10 = vld [vmem:[#allocation8] ss:$0 sm:$0xff] }
  0x39   :  { %v67_v6 = vpack.c.bf16 %v64_v5, %v63_v3  ;;  %v59_v7 = vld [vmem:[#allocation3] sm:$0xff]  ;;  %v60_v8 = vld [vmem:[#allocation3 + $0x8] sm:$0xff]  ;;  %vm135_vm2 = vcmask 523264   ;;  %s286_s0 = smov [#allocation9]  }
  0x3a   :  { %162 = vmatpush3.bf16.msra.mxu0 %v66_v4  ;;  %v65_v9 = vpack.c.bf16 %v60_v8, %v59_v7  ;;  %v122_v12 = vstv %s121_s29  ;;  %s143_s30 = sshll.u32 %s286_s0, 4  ;;  %s144_s30 = int_to_ptr.vmem [resolvable:$true] %s143_s30 }
  0x3b   :  { %163 = vmatprep.subr.bf16.mxu0 %v284_v0  ;;  %s251_s5 = scalar_lea.vmem %s144_s30, 256  ;;  %p256_p11 = scmp.lt.s32.totalorder %s144_s30, %s144_s30 }
  0x3c   :  { %p252_p10 = scmp.ne.s32.totalorder %s144_s30, %s251_s5  ;;  %p257_p12 = scmp.lt.s32.totalorder %s251_s5, %s251_s5 }
  0x3e   :  { %164 = vmatpush3.bf16.msra.mxu0 %v67_v6  ;;  %p258_p13 = por %p257_p12, %p256_p11 }
  0x40   :  { %p259_p0 = pnand %p258_p13, %p252_p10 }
  0x41   :  { %166 = vmatmul.mubr.msk.bf16.vlgmr.msra.gmra.mrb[0].mxu0 %vm75_vm1, %v65_v9 }
 0x114   :  { %v113_v11 = vpop.f32.mrb[0].mxu0 }
 0x115   :  { %v114_v13 = vadd.f32 %v156_v10, %v113_v11  ;;  %v167_v14 = vpop.f32.mrb[1].mxu0 }
 0x116   :  { %v116_v15 = vpop.f32.mrb[2].mxu0 }
 0x117   :  { %v123_v16 = vmul.f32 %v122_v12, %v114_v13  ;;  %v117_v17 = vadd.f32 %v156_v10, %v116_v15  ;;  %v168_v18 = vpop.f32.mrb[3].mxu0 }
 0x119   :  { %v125_v19 = vmul.f32 1.442695, %v123_v16  ;;  %v124_v20 = vmul.f32 %v122_v12, %v117_v17 }
 0x11b   :  { %177 = vpow2.f32 %v125_v19  ;;  %v127_v21 = vmul.f32 1.442695, %v124_v20 }
 0x11d   :  { %179 = vpow2.f32 %v127_v21 }
 0x125   :  { %v178_v22 = vpop.eup %177 }
 0x126   :  { %v129_v23 = vadd.f32 1.0, %v178_v22 }
 0x127   :  { %v180_v24 = vpop.eup %179 }
 0x128   :  { %181 = vrcp.f32 %v129_v23  ;;  %v130_v25 = vadd.f32 1.0, %v180_v24 }
 0x12a   :  { %183 = vrcp.f32 %v130_v25 }
 0x132   :  { %v182_v26 = vpop.eup %181 }
 0x133   :  { %v133_v27 = vmul.f32 %v182_v26, %v114_v13 }
 0x134   :  { %v184_v28 = vpop.eup %183 }
 0x135   :  { %v134_v29 = vmul.f32 %v184_v28, %v117_v17  ;;  %136 = vst.msk [vmem:[#allocation9] sm:$0xff] %vm135_vm2, %v133_v27 }
 0x137   :  { %137 = vst.msk [vmem:[#allocation9 + $0x8] sm:$0xff] %vm135_vm2, %v134_v29 }
 0x138   :  { %262 = shalt.err (!%p259_p0)
}
 0x139   :  { %s263_s8 = scalar_lea.hbm %s383_s4, 256 }
 0x13a   :  { %p264_p1 = scmp.ne.s32.totalorder %s383_s4, %s263_s8  ;;  %p267_p2 = scmp.lt.u32.totalorder %s263_s8, %s383_s4 }
 0x13c   :  { %p269_p3 = pnand %p267_p2, %p264_p1 }
 0x13e   :  { %272 = shalt.err (!%p269_p3)
}
 0x13f   :  { %149 = dma.vmem_to_hbm [thread:$0]  %s144_s30, 256, %s383_s4, [#allocation5], %s281_s27, %s281_s27, %s282_s28  }
 0x140   :  { %277 = dma.done.wait [#allocation5], 256  }
 0x141   :  { %278 = vsyncadd [#allocation5], 4294967040 }
 0x142   :  { %153 = vsyncpa [#allocation4], 1 }
 0x143   :  { %154 = vsyncpa [#allocation7], 1 }
 0x144   :  { %155 = vsyncpa [#allocation5], 1 }

</bundles_post_ra>
